<compile_context>
chip_gen: v7x
topology: tpu7x:2x2x1
jax: 0.10.0
libtpu: 0.0.40
codegen_flags: <defaults>
</compile_context>

<pallas_src>
import math
import functools

import jax
import jax.numpy as jnp
from jax import lax
from jax.experimental import pallas as pl
from jax.experimental.pallas import tpu as pltpu


# ------------------------- parameter preparation (once) -----------------------
def prepare_qkv_params(params, use_bf16_mxu=True):
    """Hoisted out of the forward: cast weights to the MXU dtype, biases to [1, H] f32."""
    mxu_dtype = jnp.bfloat16 if use_bf16_mxu else jnp.float32
    return {
        "wq": params["wq"].astype(mxu_dtype),
        "wk": params["wk"].astype(mxu_dtype),
        "wv": params["wv"].astype(mxu_dtype),
        "bq": params["bq"].reshape(1, -1).astype(jnp.float32),
        "bk": params["bk"].reshape(1, -1).astype(jnp.float32),
        "bv": params["bv"].reshape(1, -1).astype(jnp.float32),
    }


# ----------------------- fused QKV projection kernel --------------------------
def _fused_qkv_kernel(x_ref, wq_ref, wk_ref, wv_ref, bq_ref, bk_ref, bv_ref,
                      q_ref, k_ref, v_ref):
    # x tile [tm, H] is read once from HBM as f32 and cast to the MXU dtype here
    # (no separate XLA cast pass over hidden_states).
    x = x_ref[...].astype(wq_ref.dtype)
    q_ref[...] = (jnp.dot(x, wq_ref[...], preferred_element_type=jnp.float32)
                  + bq_ref[...]).astype(q_ref.dtype)
    k_ref[...] = (jnp.dot(x, wk_ref[...], preferred_element_type=jnp.float32)
                  + bk_ref[...]).astype(k_ref.dtype)
    v_ref[...] = (jnp.dot(x, wv_ref[...], preferred_element_type=jnp.float32)
                  + bv_ref[...]).astype(v_ref.dtype)


def pallas_fused_qkv(x2d, wq, wk, wv, bq, bk, bv, out_dtype):
    M, K = x2d.shape
    N = wq.shape[1]
    # Smaller row tile for f32 keeps headroom inside v7x's 32 MiB default scoped VMEM.
    row_tile = 512 if jnp.dtype(out_dtype) == jnp.dtype(jnp.bfloat16) else 256
    tm = min(M, row_tile)

    w_spec = pl.BlockSpec((K, N), lambda i: (0, 0))   # weights resident
    b_spec = pl.BlockSpec((1, N), lambda i: (0, 0))   # biases resident
    o_spec = pl.BlockSpec((tm, N), lambda i: (i, 0))  # lane-dense outputs
    out_sds = jax.ShapeDtypeStruct((M, N), out_dtype)

    return pl.pallas_call(
        _fused_qkv_kernel,
        out_shape=(out_sds, out_sds, out_sds),
        grid=(pl.cdiv(M, tm),),
        in_specs=[pl.BlockSpec((tm, K), lambda i: (i, 0)),   # x rows tiled + pipelined
                  w_spec, w_spec, w_spec, b_spec, b_spec, b_spec],
        out_specs=(o_spec, o_spec, o_spec),
        compiler_params=pltpu.CompilerParams(dimension_semantics=("parallel",)),
    )(x2d, wq, wk, wv, bq, bk, bv)


# ------------------------------ attention kernel -------------------------------
def _attn_kernel(q_ref, k_ref, v_ref, m_ref, ctx_ref, *opt_refs,
                 scale, heads_per_block, head_dim):
    # Per (batch, head-group) grid point.
    #   q/k/v refs: [S, HB*D]   (heads live in the lane dimension -> no HBM transpose)
    #   mask ref:   [1, S]      (additive, f32)
    #   ctx ref:    [S, HB*D]   (lane-dense slab of the [B, S, H] output)
    #   probs ref:  [HB, S, S]  (only when output_attentions)
    probs_ref = opt_refs[0] if opt_refs else None

    m = m_ref[...]                                         # [1, S] f32
    keep_scaled = (m >= 0.0).astype(jnp.float32) * scale   # fold 1/sqrt(D) into keep

    for h in range(heads_per_block):                       # static unroll (HB small)
        lo, hi = h * head_dim, (h + 1) * head_dim
        qh = q_ref[:, lo:hi]                               # [S, D]
        kh = k_ref[:, lo:hi]                               # [S, D]
        vh = v_ref[:, lo:hi]                               # [S, D]

        # q @ k^T without an explicit transpose: contract the D axis of both operands.
        s = lax.dot_general(qh, kh, (((1,), (1,)), ((), ())),
                            preferred_element_type=jnp.float32)   # [S, S] f32
        s = s * keep_scaled + m                             # reference mask semantics

        # numerically-stable softmax, all elementwise math in f32 (v5e-safe)
        s = s - jnp.max(s, axis=-1, keepdims=True)
        e = jnp.exp(s)
        denom = jnp.sum(e, axis=-1, keepdims=True)          # [S, 1]

        if probs_ref is not None:
            # probs requested: normalize explicitly (multiply, not S^2 divides)
            p = e * pl.reciprocal(denom, approx=False)
            probs_ref[h] = p.astype(probs_ref.dtype)
            ctx_h = jnp.dot(p.astype(vh.dtype), vh,
                            preferred_element_type=jnp.float32)   # [S, D] f32
        else:
            # fast path: deferred normalization -> S*D multiply instead of S^2,
            # approx reciprocal runs on the EUP slot (effectively free).
            ctx_h = jnp.dot(e.astype(vh.dtype), vh,
                            preferred_element_type=jnp.float32)
            ctx_h = ctx_h * pl.reciprocal(denom, approx=True)

        # per-head write into the lane-dense ctx slab (no concatenate / long live ranges)
        ctx_ref[:, lo:hi] = ctx_h.astype(ctx_ref.dtype)


def _pick_heads_per_block(num_heads, head_dim, output_attentions):
    lane_ok = [hb for hb in range(1, num_heads + 1)
               if num_heads % hb == 0 and (hb * head_dim) % 128 == 0]
    if output_attentions:
        # keep the [HB, S, S] probs block small but lane-dense
        return lane_ok[0] if lane_ok else num_heads
    # no probs writeback: widest lane-dense ctx stores, fewest grid steps
    return lane_ok[-1] if lane_ok else num_heads


def pallas_attention(q, k, v, mask, num_heads, *, output_attentions=False,
                     probs_dtype=jnp.float32):
    # q, k, v: [B, S, H] (heads packed in lanes); mask: [B, 1, 1, S] additive f32
    B, S, H = q.shape
    D = H // num_heads
    HB = _pick_heads_per_block(num_heads, D, output_attentions)
    scale = 1.0 / math.sqrt(D)
    kernel = functools.partial(_attn_kernel, scale=scale,
                               heads_per_block=HB, head_dim=D)

    qkv_spec = pl.BlockSpec((None, S, HB * D), lambda b, g: (b, 0, g))
    mask_spec = pl.BlockSpec((None, None, 1, S), lambda b, g: (b, 0, 0, 0))

    out_shape = [jax.ShapeDtypeStruct((B, S, H), q.dtype)]
    out_specs = [pl.BlockSpec((None, S, HB * D), lambda b, g: (b, 0, g))]
    if output_attentions:
        out_shape.append(jax.ShapeDtypeStruct((B, num_heads, S, S), probs_dtype))
        out_specs.append(pl.BlockSpec((None, HB, S, S), lambda b, g: (b, g, 0, 0)))

    outs = pl.pallas_call(
        kernel,
        out_shape=tuple(out_shape),
        grid=(B, num_heads // HB),
        in_specs=[qkv_spec, qkv_spec, qkv_spec, mask_spec],
        out_specs=tuple(out_specs),
        compiler_params=pltpu.CompilerParams(
            dimension_semantics=("parallel", "parallel")),
    )(q, k, v, mask)
    if not isinstance(outs, (tuple, list)):
        outs = (outs,)
    ctx = outs[0]
    probs = outs[1] if output_attentions else None
    return ctx, probs


# ------------------------------- module wrapper --------------------------------
def bert_self_attention(hidden_states, attention_mask, prepared_params, num_heads,
                        output_attentions=False, probs_dtype=jnp.float32):
    """BertSelfAttention.forward (default path; eval-mode dropout = identity).

    `prepared_params` comes from prepare_qkv_params() (weights pre-cast once)."""
    B, S, H = hidden_states.shape
    M = B * S
    mxu_dtype = prepared_params["wq"].dtype

    x2d = hidden_states.reshape(M, H)                        # f32; cast happens in-kernel
    q2d, k2d, v2d = pallas_fused_qkv(
        x2d,
        prepared_params["wq"], prepared_params["wk"], prepared_params["wv"],
        prepared_params["bq"], prepared_params["bk"], prepared_params["bv"],
        out_dtype=mxu_dtype)

    # reshape only (contiguous) -- no HBM transpose to [B, NH, S, D]
    q = q2d.reshape(B, S, H)
    k = k2d.reshape(B, S, H)
    v = v2d.reshape(B, S, H)

    ctx, probs = pallas_attention(q, k, v, attention_mask, num_heads,
                                  output_attentions=output_attentions,
                                  probs_dtype=probs_dtype)
    if output_attentions:
        return ctx, probs
    return (ctx,)


# ------------------------------- reference (JAX) --------------------------------
def reference(hidden_states, attention_mask, params, num_heads):
    B, S, H = hidden_states.shape
    D = H // num_heads
    x2d = hidden_states.reshape(B * S, H)
    q = (x2d @ params["wq"] + params["bq"]).reshape(B, S, num_heads, D).transpose(0, 2, 1, 3)
    k = (x2d @ params["wk"] + params["bk"]).reshape(B, S, num_heads, D).transpose(0, 2, 1, 3)
    v = (x2d @ params["wv"] + params["bv"]).reshape(B, S, num_heads, D).transpose(0, 2, 1, 3)
    scores = jnp.einsum("bhqd,bhkd->bhqk", q, k) / math.sqrt(D)
    scores = scores * (attention_mask >= 0).astype(jnp.float32) + attention_mask
    probs = jax.nn.softmax(scores, axis=-1)
    ctx = jnp.einsum("bhqk,bhkd->bhqd", probs, v)
    ctx = ctx.transpose(0, 2, 1, 3).reshape(B, S, H)
    return ctx, probs


if __name__ == "__main__":
    def make_inputs(key, B, S, H, NH):
        ks = jax.random.split(key, 8)
        hidden = jax.random.normal(ks[0], (B, S, H), dtype=jnp.float32)
        w_scale = 1.0 / math.sqrt(H)
        params = {
            "wq": jax.random.normal(ks[1], (H, H), jnp.float32) * w_scale,
            "wk": jax.random.normal(ks[2], (H, H), jnp.float32) * w_scale,
            "wv": jax.random.normal(ks[3], (H, H), jnp.float32) * w_scale,
            "bq": jax.random.normal(ks[4], (H,), jnp.float32) * 0.1,
            "bk": jax.random.normal(ks[5], (H,), jnp.float32) * 0.1,
            "bv": jax.random.normal(ks[6], (H,), jnp.float32) * 0.1,
        }
        # standard BERT additive mask [B,1,1,S]: 0 keep, -10000 pad
        keep = (jax.random.uniform(ks[7], (B, 1, 1, S)) > 0.2).astype(jnp.float32)
        mask = (1.0 - keep) * -10000.0
        return hidden, mask, params

    key = jax.random.PRNGKey(0)
    k1, k2 = jax.random.split(key)

    # --- config 1: small shapes, f32 MXU, with attention probs output ----------
    B, S, H, NH = 2, 8, 32, 4
    hidden, mask, params = make_inputs(k1, B, S, H, NH)
    prep_f32 = prepare_qkv_params(params, use_bf16_mxu=False)
    ctx, probs = bert_self_attention(hidden, mask, prep_f32, NH, output_attentions=True)
    jax.block_until_ready((ctx, probs))
    ref_ctx, ref_probs = reference(hidden, mask, params, NH)
    assert jnp.allclose(ctx, ref_ctx, atol=1e-4, rtol=1e-4), "config1 context mismatch"
    assert jnp.allclose(probs, ref_probs, atol=1e-5, rtol=1e-5), "config1 probs mismatch"

    # --- config 2: BERT-like head_dim=64 (2 heads/block, lane-dense probs path) -
    B2, S2, H2, NH2 = 1, 16, 256, 4
    hidden2, mask2, params2 = make_inputs(k2, B2, S2, H2, NH2)
    prep2_f32 = prepare_qkv_params(params2, use_bf16_mxu=False)
    ctx2, probs2 = bert_self_attention(hidden2, mask2, prep2_f32, NH2, output_attentions=True)
    jax.block_until_ready((ctx2, probs2))
    ref_ctx2, ref_probs2 = reference(hidden2, mask2, params2, NH2)
    assert jnp.allclose(ctx2, ref_ctx2, atol=1e-4, rtol=1e-4), "config2 context mismatch"
    assert jnp.allclose(probs2, ref_probs2, atol=1e-4, rtol=1e-4), "config2 probs mismatch"

    # --- config 3: f32 fast path (no probs): deferred norm + approx reciprocal --
    (ctx2f,) = bert_self_attention(hidden2, mask2, prep2_f32, NH2, output_attentions=False)
    jax.block_until_ready(ctx2f)
    assert jnp.allclose(ctx2f, ref_ctx2, atol=5e-3, rtol=5e-3), "config3 context mismatch"

    # --- config 4: default fast path: bf16 MXU operands, no probs output --------
    prep_bf16 = prepare_qkv_params(params, use_bf16_mxu=True)
    (ctx4,) = bert_self_attention(hidden, mask, prep_bf16, NH, output_attentions=False)
    jax.block_until_ready(ctx4)
    assert jnp.allclose(ctx4.astype(jnp.float32), ref_ctx, atol=0.3, rtol=0.3), \
        "config4 (bf16) context mismatch"

    print("KERNEL_OK")
</pallas_src>

<mosaic_0001>
module attributes {stable_mosaic.version = 11 : i64} {
  func.func @_fused_qkv_kernel(%arg0: i32, %arg1: memref<16x32xf32, #tpu.memory_space<vmem>>, %arg2: memref<32x32xf32, #tpu.memory_space<vmem>>, %arg3: memref<32x32xf32, #tpu.memory_space<vmem>>, %arg4: memref<32x32xf32, #tpu.memory_space<vmem>>, %arg5: memref<1x32xf32, #tpu.memory_space<vmem>>, %arg6: memref<1x32xf32, #tpu.memory_space<vmem>>, %arg7: memref<1x32xf32, #tpu.memory_space<vmem>>, %arg8: memref<16x32xf32, #tpu.memory_space<vmem>>, %arg9: memref<16x32xf32, #tpu.memory_space<vmem>>, %arg10: memref<16x32xf32, #tpu.memory_space<vmem>>) attributes {dimension_semantics = [#tpu.dimension_semantics<parallel>], iteration_bounds = array<i64: 1>, scalar_prefetch = 0 : i64, scratch_operands = 0 : i64, tpu.core_type = #tpu.core_type<tc>, window_params = [{transform_indices = @transform_0, window_bounds = array<i64: 16, 32>}, {pipeline_mode = #tpu.pipeline_mode<synchronous>, transform_indices = @transform_1, window_bounds = array<i64: 32, 32>}, {pipeline_mode = #tpu.pipeline_mode<synchronous>, transform_indices = @transform_2, window_bounds = array<i64: 32, 32>}, {pipeline_mode = #tpu.pipeline_mode<synchronous>, transform_indices = @transform_3, window_bounds = array<i64: 32, 32>}, {pipeline_mode = #tpu.pipeline_mode<synchronous>, transform_indices = @transform_4, window_bounds = array<i64: 1, 32>}, {pipeline_mode = #tpu.pipeline_mode<synchronous>, transform_indices = @transform_5, window_bounds = array<i64: 1, 32>}, {pipeline_mode = #tpu.pipeline_mode<synchronous>, transform_indices = @transform_6, window_bounds = array<i64: 1, 32>}, {transform_indices = @transform_7, window_bounds = array<i64: 16, 32>}, {transform_indices = @transform_8, window_bounds = array<i64: 16, 32>}, {transform_indices = @transform_9, window_bounds = array<i64: 16, 32>}]} {
    %c0 = arith.constant 0 : index
    %c0_0 = arith.constant 0 : index
    %0 = vector.load %arg1[%c0, %c0_0] : memref<16x32xf32, #tpu.memory_space<vmem>>, vector<16x32xf32>
    %c0_1 = arith.constant 0 : index
    %c0_2 = arith.constant 0 : index
    %1 = vector.load %arg2[%c0_1, %c0_2] : memref<32x32xf32, #tpu.memory_space<vmem>>, vector<32x32xf32>
    %cst = arith.constant dense<0.000000e+00> : vector<16x32xf32>
    %2 = tpu.matmul %0, %1, %cst {dimension_numbers = #tpu.dot_dimension_numbers<[1], [0], [0], [1], [0, 0, 1, 1], [], []>} : vector<16x32xf32>, vector<32x32xf32>, vector<16x32xf32> -> vector<16x32xf32>
    %c0_3 = arith.constant 0 : index
    %c0_4 = arith.constant 0 : index
    %3 = vector.load %arg5[%c0_3, %c0_4] : memref<1x32xf32, #tpu.memory_space<vmem>>, vector<1x32xf32>
    %4 = vector.broadcast %3 : vector<1x32xf32> to vector<16x32xf32>
    %5 = arith.addf %2, %4 : vector<16x32xf32>
    %c0_5 = arith.constant 0 : index
    %c0_6 = arith.constant 0 : index
    %6 = vector.load %arg8[%c0_5, %c0_6] : memref<16x32xf32, #tpu.memory_space<vmem>>, vector<16x32xf32>
    tpu.vector_store %arg8[%c0_5, %c0_6], %5 {strides = array<i32>} : memref<16x32xf32, #tpu.memory_space<vmem>>, vector<16x32xf32>,
    %c0_7 = arith.constant 0 : index
    %c0_8 = arith.constant 0 : index
    %7 = vector.load %arg3[%c0_7, %c0_8] : memref<32x32xf32, #tpu.memory_space<vmem>>, vector<32x32xf32>
    %cst_9 = arith.constant dense<0.000000e+00> : vector<16x32xf32>
    %8 = tpu.matmul %0, %7, %cst_9 {dimension_numbers = #tpu.dot_dimension_numbers<[1], [0], [0], [1], [0, 0, 1, 1], [], []>} : vector<16x32xf32>, vector<32x32xf32>, vector<16x32xf32> -> vector<16x32xf32>
    %c0_10 = arith.constant 0 : index
    %c0_11 = arith.constant 0 : index
    %9 = vector.load %arg6[%c0_10, %c0_11] : memref<1x32xf32, #tpu.memory_space<vmem>>, vector<1x32xf32>
    %10 = vector.broadcast %9 : vector<1x32xf32> to vector<16x32xf32>
    %11 = arith.addf %8, %10 : vector<16x32xf32>
    %c0_12 = arith.constant 0 : index
    %c0_13 = arith.constant 0 : index
    %12 = vector.load %arg9[%c0_12, %c0_13] : memref<16x32xf32, #tpu.memory_space<vmem>>, vector<16x32xf32>
    tpu.vector_store %arg9[%c0_12, %c0_13], %11 {strides = array<i32>} : memref<16x32xf32, #tpu.memory_space<vmem>>, vector<16x32xf32>,
    %c0_14 = arith.constant 0 : index
    %c0_15 = arith.constant 0 : index
    %13 = vector.load %arg4[%c0_14, %c0_15] : memref<32x32xf32, #tpu.memory_space<vmem>>, vector<32x32xf32>
    %cst_16 = arith.constant dense<0.000000e+00> : vector<16x32xf32>
    %14 = tpu.matmul %0, %13, %cst_16 {dimension_numbers = #tpu.dot_dimension_numbers<[1], [0], [0], [1], [0, 0, 1, 1], [], []>} : vector<16x32xf32>, vector<32x32xf32>, vector<16x32xf32> -> vector<16x32xf32>
    %c0_17 = arith.constant 0 : index
    %c0_18 = arith.constant 0 : index
    %15 = vector.load %arg7[%c0_17, %c0_18] : memref<1x32xf32, #tpu.memory_space<vmem>>, vector<1x32xf32>
    %16 = vector.broadcast %15 : vector<1x32xf32> to vector<16x32xf32>
    %17 = arith.addf %14, %16 : vector<16x32xf32>
    %c0_19 = arith.constant 0 : index
    %c0_20 = arith.constant 0 : index
    %18 = vector.load %arg10[%c0_19, %c0_20] : memref<16x32xf32, #tpu.memory_space<vmem>>, vector<16x32xf32>
    tpu.vector_store %arg10[%c0_19, %c0_20], %17 {strides = array<i32>} : memref<16x32xf32, #tpu.memory_space<vmem>>, vector<16x32xf32>,
    return
  }
  func.func @transform_0(%arg0: i32) -> (i32, i32) {
    %c0_i32 = arith.constant 0 : i32
    %c0_i32_0 = arith.constant 0 : i32
    return %arg0, %c0_i32 : i32, i32
  }
  func.func @transform_1(%arg0: i32) -> (i32, i32) {
    %c0_i32 = arith.constant 0 : i32
    %c0_i32_0 = arith.constant 0 : i32
    %c0_i32_1 = arith.constant 0 : i32
    return %c0_i32, %c0_i32_0 : i32, i32
  }
  func.func @transform_2(%arg0: i32) -> (i32, i32) {
    %c0_i32 = arith.constant 0 : i32
    %c0_i32_0 = arith.constant 0 : i32
    %c0_i32_1 = arith.constant 0 : i32
    return %c0_i32, %c0_i32_0 : i32, i32
  }
  func.func @transform_3(%arg0: i32) -> (i32, i32) {
    %c0_i32 = arith.constant 0 : i32
    %c0_i32_0 = arith.constant 0 : i32
    %c0_i32_1 = arith.constant 0 : i32
    return %c0_i32, %c0_i32_0 : i32, i32
  }
  func.func @transform_4(%arg0: i32) -> (i32, i32) {
    %c0_i32 = arith.constant 0 : i32
    %c0_i32_0 = arith.constant 0 : i32
    %c0_i32_1 = arith.constant 0 : i32
    return %c0_i32, %c0_i32_0 : i32, i32
  }
  func.func @transform_5(%arg0: i32) -> (i32, i32) {
    %c0_i32 = arith.constant 0 : i32
    %c0_i32_0 = arith.constant 0 : i32
    %c0_i32_1 = arith.constant 0 : i32
    return %c0_i32, %c0_i32_0 : i32, i32
  }
  func.func @transform_6(%arg0: i32) -> (i32, i32) {
    %c0_i32 = arith.constant 0 : i32
    %c0_i32_0 = arith.constant 0 : i32
    %c0_i32_1 = arith.constant 0 : i32
    return %c0_i32, %c0_i32_0 : i32, i32
  }
  func.func @transform_7(%arg0: i32) -> (i32, i32) {
    %c0_i32 = arith.constant 0 : i32
    %c0_i32_0 = arith.constant 0 : i32
    return %arg0, %c0_i32 : i32, i32
  }
  func.func @transform_8(%arg0: i32) -> (i32, i32) {
    %c0_i32 = arith.constant 0 : i32
    %c0_i32_0 = arith.constant 0 : i32
    return %arg0, %c0_i32 : i32, i32
  }
  func.func @transform_9(%arg0: i32) -> (i32, i32) {
    %c0_i32 = arith.constant 0 : i32
    %c0_i32_0 = arith.constant 0 : i32
    return %arg0, %c0_i32 : i32, i32
  }
}

</mosaic_0001>

<bundles_post_ra>
// kernel: tpu_custom_call.1
= control target key start
LH: loop header
LB: loop body
LE: loop exit
PB: predicated region body
PF: predicated region fallthrough
CT: control target
= control target key end

     0   :  { %15 = vsyncpa [#allocation3], 0  ;;  %s872_s0 = inlined_call_operand.hbm [shape: f32[16,32], index: 0, kind: input, shape index: {}]   ;;  %s873_s1 = inlined_call_operand.hbm [shape: f32[32,32], index: 1, kind: input, shape index: {}]   ;;  %s874_s2 = inlined_call_operand.hbm [shape: f32[32,32], index: 2, kind: input, shape index: {}]   ;;  %s875_s3 = inlined_call_operand.hbm [shape: f32[32,32], index: 3, kind: input, shape index: {}]   ;;  %s876_s4 = inlined_call_operand.vmem [shape: f32[1,32], index: 4, kind: input, shape index: {}]   ;;  %s877_s5 = inlined_call_operand.vmem [shape: f32[1,32], index: 5, kind: input, shape index: {}]   ;;  %s878_s6 = inlined_call_operand.vmem [shape: f32[1,32], index: 6, kind: input, shape index: {}]   ;;  %s879_s7 = inlined_call_operand.hbm [shape: f32[16,32], index: 7, kind: output, shape index: {0}]   ;;  %s880_s8 = inlined_call_operand.hbm [shape: f32[16,32], index: 8, kind: output, shape index: {1}]   ;;  %s881_s9 = inlined_call_operand.hbm [shape: f32[16,32], index: 9, kind: output, shape index: {2}]  }
   0x1   :  { %16 = vsyncpa [#allocation6], 0 }
   0x2   :  { %17 = vsyncpa [#allocation9], 0 }
   0x3   :  { %18 = vsyncpa [#allocation4], 0 }
   0x4   :  { %19 = vsyncpa [#allocation12], 0  ;;  %s666_s30 = smov [#allocation5]   ;;  %s667_s11 = smov [#allocation2]  }
   0x5   :  { %s37_s10 = sshll.u32 %s666_s30, 4  ;;  %s25_s12 = sshll.u32 %s667_s11, 4  ;;  %s38_s10 = int_to_ptr.vmem [resolvable:$true] %s37_s10  ;;  %s725_s12 = int_to_ptr.vmem [resolvable:$true] %s25_s12 }
   0x6   :  { %s502_s15 = scalar_lea.hbm %s873_s1, 512 }
   0x7   :  { %p503_p0 = scmp.ne.s32.totalorder %s873_s1, %s502_s15  ;;  %p506_p1 = scmp.lt.u32.totalorder %s502_s15, %s873_s1 }
   0x9   :  { %p508_p2 = pnand %p506_p1, %p503_p0 }
   0xb   :  { %511 = shalt.err (!%p508_p2)
}
   0xc   :  { %s512_s20 = scalar_lea.vmem %s38_s10, 512  ;;  %p517_p4 = scmp.lt.s32.totalorder %s38_s10, %s38_s10 }
   0xd   :  { %p513_p3 = scmp.ne.s32.totalorder %s38_s10, %s512_s20  ;;  %p518_p5 = scmp.lt.s32.totalorder %s512_s20, %s512_s20 }
   0xf   :  { %p519_p6 = por %p518_p5, %p517_p4 }
  0x11   :  { %p520_p7 = pnand %p519_p6, %p513_p3 }
  0x13   :  { %523 = shalt.err (!%p520_p7)
}
  0x14   :  { %s668_s21 = smov 128   ;;  %s669_s22 = smov 8  }
  0x15   :  { %43 = dma.hbm_to_vmem [thread:$0]  %s873_s1, 512, %s38_s10, [#allocation6], %s668_s21, %s668_s21, %s669_s22  }
  0x16   :  { %s524_s27 = scalar_lea.hbm %s872_s0, 256 }
  0x17   :  { %p525_p8 = scmp.ne.s32.totalorder %s872_s0, %s524_s27  ;;  %p528_p9 = scmp.lt.u32.totalorder %s524_s27, %s872_s0 }
  0x19   :  { %p530_p10 = pnand %p528_p9, %p525_p8 }
  0x1b   :  { %533 = shalt.err (!%p530_p10)
}
  0x1c   :  { %s534_s13 = scalar_lea.vmem %s725_s12, 256  ;;  %p539_p12 = scmp.lt.s32.totalorder %s725_s12, %s725_s12 }
  0x1d   :  { %p535_p11 = scmp.ne.s32.totalorder %s725_s12, %s534_s13  ;;  %p540_p13 = scmp.lt.s32.totalorder %s534_s13, %s534_s13 }
  0x1f   :  { %p541_p0 = por %p540_p13, %p539_p12 }
  0x21   :  { %p542_p1 = pnand %p541_p0, %p535_p11 }
  0x23   :  { %545 = shalt.err (!%p542_p1)
}
  0x24   :  { %31 = dma.hbm_to_vmem [thread:$0]  %s872_s0, 256, %s725_s12, [#allocation3], %s668_s21, %s668_s21, %s669_s22  }
  0x25   :  { %s670_s14 = smov [#allocation7]   ;;  %s671_s16 = smov [#allocation8]  }
  0x26   :  { %s49_s15 = sshll.u32 %s670_s14, 4  ;;  %s61_s17 = sshll.u32 %s671_s16, 4  ;;  %s50_s15 = int_to_ptr.vmem [resolvable:$true] %s49_s15  ;;  %s762_s17 = int_to_ptr.vmem [resolvable:$true] %s61_s17 }
  0x27   :  { %s546_s20 = scalar_lea.hbm %s874_s2, 512 }
  0x28   :  { %p547_p2 = scmp.ne.s32.totalorder %s874_s2, %s546_s20  ;;  %p550_p3 = scmp.lt.u32.totalorder %s546_s20, %s874_s2 }
  0x2a   :  { %p552_p4 = pnand %p550_p3, %p547_p2 }
  0x2c   :  { %555 = shalt.err (!%p552_p4)
}
  0x2d   :  { %s556_s0 = scalar_lea.vmem %s50_s15, 512  ;;  %p561_p6 = scmp.lt.s32.totalorder %s50_s15, %s50_s15 }
  0x2e   :  { %p557_p5 = scmp.ne.s32.totalorder %s50_s15, %s556_s0  ;;  %p562_p7 = scmp.lt.s32.totalorder %s556_s0, %s556_s0 }
  0x30   :  { %p563_p8 = por %p562_p7, %p561_p6 }
  0x32   :  { %p564_p9 = pnand %p563_p8, %p557_p5 }
  0x34   :  { %567 = shalt.err (!%p564_p9)
}
  0x35   :  { %55 = dma.hbm_to_vmem [thread:$0]  %s874_s2, 512, %s50_s15, [#allocation6], %s668_s21, %s668_s21, %s669_s22  }
  0x36   :  { %s568_s30 = scalar_lea.hbm %s875_s3, 512 }
  0x37   :  { %p569_p10 = scmp.ne.s32.totalorder %s875_s3, %s568_s30  ;;  %p572_p11 = scmp.lt.u32.totalorder %s568_s30, %s875_s3 }
  0x39   :  { %p574_p12 = pnand %p572_p11, %p569_p10 }
  0x3b   :  { %577 = shalt.err (!%p574_p12)
}
  0x3c   :  { %s578_s14 = scalar_lea.vmem %s762_s17, 512  ;;  %p583_p0 = scmp.lt.s32.totalorder %s762_s17, %s762_s17 }
  0x3d   :  { %p579_p13 = scmp.ne.s32.totalorder %s762_s17, %s578_s14  ;;  %p584_p1 = scmp.lt.s32.totalorder %s578_s14, %s578_s14 }
  0x3f   :  { %p585_p2 = por %p584_p1, %p583_p0 }
  0x41   :  { %p586_p3 = pnand %p585_p2, %p579_p13 }
  0x43   :  { %589 = shalt.err (!%p586_p3)
}
  0x44   :  { %67 = dma.hbm_to_vmem [thread:$0]  %s875_s3, 512, %s762_s17, [#allocation9], %s668_s21, %s668_s21, %s669_s22  }
  0x45   :  { %656 = dma.done.wait [#allocation3], 256  }
  0x46   :  { %657 = vsyncadd [#allocation3], 4294967040 }
  0x47   :  { %658 = dma.done.wait [#allocation6], 1024  }
  0x48   :  { %659 = vsyncadd [#allocation6], 4294966272 }
  0x49   :  { %660 = dma.done.wait [#allocation9], 512  }
  0x4a   :  { %661 = vsyncadd [#allocation9], 4294966784  ;;  %v88_v0 = vld [vmem:[#allocation5] sm:$0xff]  ;;  %v89_v1 = vld [vmem:[#allocation5 + $0x8] sm:$0xff]  ;;  %vm99_vm0 = vcmask 261120   ;;  %s672_s19 = smov [#allocation10]  }
  0x4b   :  { %v90_v2 = vld [vmem:[#allocation5 + $0x10] sm:$0xff]  ;;  %v469_v3 = vpack.c.bf16 %v89_v1, %v88_v0  ;;  %v91_v4 = vld [vmem:[#allocation5 + $0x18] sm:$0xff]  ;;  %v183_v5 = vld [vmem:[#allocation7] sm:$0xff]  ;;  %s364_s20 = sshll.u32 %s672_s19, 4  ;;  %s673_s23 = smov [#allocation11]   ;;  %s365_s20 = int_to_ptr.vmem [resolvable:$true] %s364_s20 }
  0x4c   :  { %v184_v6 = vld [vmem:[#allocation7 + $0x8] sm:$0xff]  ;;  %v473_v7 = vpack.c.bf16 %v91_v4, %v90_v2  ;;  %v86_v9 = vld [vmem:[#allocation2] sm:$0xff]  ;;  %v271_v10 = vld [vmem:[#allocation8] sm:$0xff]  ;;  %s376_s24 = sshll.u32 %s673_s23, 4  ;;  %s590_s25 = scalar_lea.vmem %s365_s20, 256  ;;  %s812_s24 = int_to_ptr.vmem [resolvable:$true] %s376_s24 }
  0x4d   :  { %v477_v8 = vpack.c.bf16 %v184_v6, %v183_v5  ;;  %470 = vmatprep.subr.bf16.mxu0 %v469_v3  ;;  %444 = vmatprep.mubr.msk.f32.mxu0 %vm99_vm0, %v86_v9  ;;  %v272_v11 = vld [vmem:[#allocation8 + $0x8] sm:$0xff]  ;;  %v185_v12 = vld [vmem:[#allocation7 + $0x10] sm:$0xff]  ;;  %v186_v13 = vld [vmem:[#allocation7 + $0x18] sm:$0xff]  ;;  %p591_p4 = scmp.ne.s32.totalorder %s365_s20, %s590_s25  ;;  %p595_p5 = scmp.lt.s32.totalorder %s365_s20, %s365_s20 }
  0x4e   :  { %472 = vmatpush3.bf16.msra.mxu0 %v469_v3  ;;  %v481_v14 = vpack.c.bf16 %v186_v13, %v185_v12  ;;  %v485_v15 = vpack.c.bf16 %v272_v11, %v271_v10  ;;  %v273_v16 = vld [vmem:[#allocation8 + $0x10] sm:$0xff]  ;;  %v274_v17 = vld [vmem:[#allocation8 + $0x18] sm:$0xff]  ;;  %455 = vmatprep.mubr.msk.f32.mxu1 %vm99_vm0, %v86_v9  ;;  %p596_p6 = scmp.lt.s32.totalorder %s590_s25, %s590_s25 }
  0x4f   :  { %478 = vmatprep.subr.bf16.mxu1 %v477_v8  ;;  %474 = vmatprep.subr.bf16.mxu0 %v473_v7  ;;  %v87_v18 = vld [vmem:[#allocation2 + $0x8] sm:$0xff]  ;;  %v489_v19 = vpack.c.bf16 %v274_v17, %v273_v16  ;;  %v409_v20 = vld [vmem:[%s876_s4] ss:$0 sm:$0xff] }
  0x50   :  { %480 = vmatpush3.bf16.msra.mxu1 %v477_v8  ;;  %v412_v21 = vld [vmem:[%s877_s5] ss:$0 sm:$0xff]  ;;  %p597_p7 = por %p596_p6, %p595_p5 }
  0x51   :  { %482 = vmatprep.subr.bf16.mxu1 %v481_v14  ;;  %v415_v30 = vld [vmem:[%s878_s6] ss:$0 sm:$0xff] }
  0x52   :  { %476 = vmatpush3.bf16.msra.mxu0 %v473_v7  ;;  %p598_p8 = pnand %p597_p7, %p591_p4 }
  0x53   :  { %486 = vmatprep.subr.bf16.mxu0 %v485_v15 }
  0x54   :  { %484 = vmatpush3.bf16.msra.mxu1 %v481_v14 }
  0x55   :  { %445 = vmatmul.mubr.msk.f32.vlgmr.msra.gmra.mrb[0].mxu0 %vm99_vm0, %v87_v18 }
  0x56   :  { %488 = vmatpush3.bf16.msra.mxu0 %v485_v15  ;;  %466 = vmatprep.mubr.msk.f32.mxu0 %vm99_vm0, %v86_v9 }
  0x57   :  { %456 = vmatmul.mubr.msk.f32.vlgmr.msra.gmra.mrb[0].mxu1 %vm99_vm0, %v87_v18  ;;  %490 = vmatprep.subr.bf16.mxu0 %v489_v19 }
  0x5a   :  { %492 = vmatpush3.bf16.msra.mxu0 %v489_v19 }
  0x5d   :  { %467 = vmatmul.mubr.msk.f32.vlgmr.msra.gmra.mrb[2].mxu0 %vm99_vm0, %v87_v18 }
 0x128   :  { %v446_v22 = vpop.f32.mrb[0].mxu0 }
 0x129   :  { %v178_v23 = vadd.f32 %v446_v22, %v409_v20  ;;  %v172_v24 = vpop.f32.mrb[1].mxu0 }
 0x12a   :  { %v457_v25 = vpop.f32.mrb[0].mxu1  ;;  %v173_v26 = vadd.f32 %v409_v20, %v172_v24 }
 0x12b   :  { %v266_v27 = vadd.f32 %v457_v25, %v412_v21  ;;  %v260_v28 = vpop.f32.mrb[1].mxu1  ;;  %182 = vst.msk [vmem:[#allocation10 + $0x8] sm:$0xff] %vm99_vm0, %v178_v23 }
 0x12c   :  { %v261_v29 = vadd.f32 %v412_v21, %v260_v28  ;;  %181 = vst.msk [vmem:[#allocation10] sm:$0xff] %vm99_vm0, %v173_v26 }
 0x12d   :  { %270 = vst.msk [vmem:[#allocation11 + $0x8] sm:$0xff] %vm99_vm0, %v266_v27 }
 0x12e   :  { %269 = vst.msk [vmem:[#allocation11] sm:$0xff] %vm99_vm0, %v261_v29 }
 0x12f   :  { %601 = shalt.err (!%p598_p8)
}
 0x130   :  { %s602_s12 = scalar_lea.hbm %s879_s7, 256 }
 0x131   :  { %p603_p9 = scmp.ne.s32.totalorder %s879_s7, %s602_s12  ;;  %p606_p10 = scmp.lt.u32.totalorder %s602_s12, %s879_s7 }
 0x133   :  { %p608_p11 = pnand %p606_p10, %p603_p9 }
 0x135   :  { %611 = shalt.err (!%p608_p11)
}
 0x136   :  { %370 = dma.vmem_to_hbm [thread:$0]  %s365_s20, 256, %s879_s7, [#allocation4], %s668_s21, %s668_s21, %s669_s22  }
 0x137   :  { %s612_s13 = scalar_lea.vmem %s812_s24, 256  ;;  %p617_p13 = scmp.lt.s32.totalorder %s812_s24, %s812_s24 }
 0x138   :  { %p613_p12 = scmp.ne.s32.totalorder %s812_s24, %s612_s13  ;;  %p618_p0 = scmp.lt.s32.totalorder %s612_s13, %s612_s13 }
 0x13a   :  { %p619_p1 = por %p618_p0, %p617_p13 }
 0x13c   :  { %p620_p2 = pnand %p619_p1, %p613_p12 }
 0x13e   :  { %623 = shalt.err (!%p620_p2)
}
 0x13f   :  { %s624_s14 = scalar_lea.hbm %s880_s8, 256 }
 0x140   :  { %p625_p3 = scmp.ne.s32.totalorder %s880_s8, %s624_s14  ;;  %p628_p4 = scmp.lt.u32.totalorder %s624_s14, %s880_s8 }
 0x142   :  { %p630_p5 = pnand %p628_p4, %p625_p3 }
 0x144   :  { %633 = shalt.err (!%p630_p5)
}
 0x145   :  { %382 = dma.vmem_to_hbm [thread:$0]  %s812_s24, 256, %s880_s8, [#allocation12], %s668_s21, %s668_s21, %s669_s22   ;;  %v468_v31 = vpop.f32.mrb[2].mxu0 }
 0x146   :  { %s674_s18 = smov [#allocation13]   ;;  %v354_v32 = vadd.f32 %v468_v31, %v415_v30  ;;  %v348_v33 = vpop.f32.mrb[3].mxu0 }
 0x147   :  { %s388_s19 = sshll.u32 %s674_s18, 4  ;;  %v349_v34 = vadd.f32 %v415_v30, %v348_v33  ;;  %s389_s19 = int_to_ptr.vmem [resolvable:$true] %s388_s19 }
 0x148   :  { %358 = vst.msk [vmem:[#allocation13 + $0x8] sm:$0xff] %vm99_vm0, %v354_v32  ;;  %s634_s20 = scalar_lea.vmem %s389_s19, 256  ;;  %p639_p7 = scmp.lt.s32.totalorder %s389_s19, %s389_s19 }
 0x149   :  { %357 = vst.msk [vmem:[#allocation13] sm:$0xff] %vm99_vm0, %v349_v34  ;;  %p635_p6 = scmp.ne.s32.totalorder %s389_s19, %s634_s20  ;;  %p640_p8 = scmp.lt.s32.totalorder %s634_s20, %s634_s20 }
 0x14b   :  { %p641_p9 = por %p640_p8, %p639_p7 }
 0x14d   :  { %p642_p10 = pnand %p641_p9, %p635_p6 }
 0x14f   :  { %645 = shalt.err (!%p642_p10)
}
 0x150   :  { %s646_s24 = scalar_lea.hbm %s881_s9, 256 }
 0x151   :  { %p647_p11 = scmp.ne.s32.totalorder %s881_s9, %s646_s24  ;;  %p650_p12 = scmp.lt.u32.totalorder %s646_s24, %s881_s9 }
 0x153   :  { %p652_p13 = pnand %p650_p12, %p647_p11 }
 0x155   :  { %655 = shalt.err (!%p652_p13)
}
 0x156   :  { %394 = dma.vmem_to_hbm [thread:$0]  %s389_s19, 256, %s881_s9, [#allocation12], %s668_s21, %s668_s21, %s669_s22  }
 0x157   :  { %662 = dma.done.wait [#allocation4], 256  }
 0x158   :  { %663 = vsyncadd [#allocation4], 4294967040 }
 0x159   :  { %664 = dma.done.wait [#allocation12], 512  }
 0x15a   :  { %665 = vsyncadd [#allocation12], 4294966784 }
 0x15b   :  { %404 = vsyncpa [#allocation3], 1 }
 0x15c   :  { %405 = vsyncpa [#allocation6], 1 }
 0x15d   :  { %406 = vsyncpa [#allocation9], 1 }
 0x15e   :  { %407 = vsyncpa [#allocation4], 1 }
 0x15f   :  { %408 = vsyncpa [#allocation12], 1 }

</bundles_post_ra>
